<compile_context>
chip_gen: v7x
topology: tpu7x:2x2x1
jax: 0.10.0
libtpu: 0.0.40
codegen_flags: <defaults>
</compile_context>

<pallas_src>
import functools
import math

import jax
import jax.numpy as jnp
from jax import lax
from jax.experimental import pallas as pl
from jax.experimental.pallas import tpu as pltpu  # noqa: F401  (kept for TPU-specific tuning hooks)

D_MODEL = 32
NHEAD = 4
DIM_FF = 64
SEQ = 8
BATCH = 2
EPS = 1e-5        # nn.LayerNorm default
LANES = 128       # TPU vreg lane width


def _ln(x, g, b):
    mu = jnp.mean(x, axis=-1, keepdims=True)
    xc = x - mu
    var = jnp.mean(xc * xc, axis=-1, keepdims=True)
    return xc * lax.rsqrt(var + EPS) * g + b


# ---------------------------------------------------------------------------
# Fused decoder-layer kernel: single invocation, everything resident in VMEM.
# ---------------------------------------------------------------------------
def _decoder_layer_kernel(x_ref, mem_ref, w_ref, v_ref, out_ref, *attn_refs,
                          batch, seq, nhead, dim_ff):
    N, E = x_ref.shape            # N = batch * seq
    F = dim_ff
    H = nhead
    hd = E // H
    scale = 1.0 / math.sqrt(hd)

    # ---- packed parameters: static slab views (weights already (in, out)) ----
    w_qkv  = w_ref[0:E,             0:3 * E]     # (E, 3E)
    w_outp = w_ref[E:2 * E,         0:E]         # (E, E)
    w_diag = w_ref[2 * E:3 * E,     0:E]         # (E, E)
    w_ff1  = w_ref[3 * E:4 * E,     0:F]         # (E, F)
    w_ff2  = w_ref[4 * E:4 * E + F, 0:E]         # (F, E)

    b_qkv  = v_ref[0:1,  0:3 * E]
    b_outp = v_ref[1:2,  0:E]
    b_diag = v_ref[2:3,  0:E]
    b_ff1  = v_ref[3:4,  0:F]
    b_ff2  = v_ref[4:5,  0:E]
    g1  = v_ref[5:6,  0:E]
    be1 = v_ref[6:7,  0:E]
    g2  = v_ref[7:8,  0:E]
    be2 = v_ref[8:9,  0:E]
    g3  = v_ref[9:10, 0:E]
    be3 = v_ref[10:11, 0:E]

    x   = x_ref[...].astype(jnp.float32)         # (N, E) batch-major slab
    mem = mem_ref[...].astype(jnp.float32)

    # ---- QKV projection once on the whole slab ----
    qkv = jnp.dot(x, w_qkv, preferred_element_type=jnp.float32) + b_qkv    # (N, 3E)

    # (N, 3E) -> (B, S, 3E): sublane-aligned leading split (S == 8 here).
    qkv3 = qkv.reshape(batch, seq, 3 * E)

    # Gather heads along the leading axis -> (H*B, S, hd); index n = h*B + b.
    def _heads(base):
        return jnp.concatenate(
            [qkv3[:, :, base + h * hd: base + (h + 1) * hd] for h in range(H)],
            axis=0)

    qh = _heads(0) * scale
    kh = _heads(E)
    vh = _heads(2 * E)

    # ---- one batched score matmul + one softmax over all (head, batch) pairs ----
    s = jnp.einsum('nqd,nkd->nqk', qh, kh, preferred_element_type=jnp.float32)
    s = s - jnp.max(s, axis=-1, keepdims=True)
    e = jnp.exp(s)
    denom = jnp.sum(e, axis=-1, keepdims=True)
    inv = pl.reciprocal(denom, approx=True)      # EUP slot (VPU stays free)
    inv = inv * (2.0 - denom * inv)              # one Newton step -> ~f32 accuracy
    p = e * inv                                  # (H*B, S, S)

    o = jnp.einsum('nqk,nkd->nqd', p, vh, preferred_element_type=jnp.float32)

    # ---- merge heads back into an (N, E) slab ----
    o4 = o.reshape(H, batch, seq, hd)                                    # leading split
    o2 = jnp.concatenate([o4[h] for h in range(H)], axis=-1).reshape(N, E)

    # ---- epilogue, once on the whole slab ----
    sa = jnp.dot(o2, w_outp, preferred_element_type=jnp.float32) + b_outp
    x1 = _ln(x + sa, g1, be1)                    # tgt + dropout1(self_attn); norm1

    diag = jnp.dot(mem, w_diag, preferred_element_type=jnp.float32) + b_diag
    x2 = _ln(x1 + diag, g2, be2)                 # + dropout2(diagonal_attn(memory)); norm2

    hid = jnp.maximum(jnp.dot(x2, w_ff1, preferred_element_type=jnp.float32) + b_ff1, 0.0)
    ffn = jnp.dot(hid, w_ff2, preferred_element_type=jnp.float32) + b_ff2
    y = _ln(x2 + ffn, g3, be3)                   # + dropout3(linear2(relu(linear1))); norm3

    out_ref[...] = y.astype(out_ref.dtype)

    if attn_refs:                                # head-averaged attention weights
        pm = jnp.mean(p.reshape(H, batch, seq, seq), axis=0)     # (B, S, S)
        attn_refs[0][...] = pm.astype(attn_refs[0].dtype)


# ---------------------------------------------------------------------------
# Host-side parameter packing: 2 lane-padded slabs instead of 16 tiny arrays.
# ---------------------------------------------------------------------------
def _pack_params(p):
    def pad_cols(a):
        a = a.astype(jnp.float32)
        return jnp.pad(a, ((0, 0), (0, LANES - a.shape[1])))

    w_slab = jnp.concatenate([
        pad_cols(p["w_in"].T),    # rows [0,   E):   (E, 3E)
        pad_cols(p["w_out"].T),   # rows [E,  2E):   (E, E)
        pad_cols(p["wd"].T),      # rows [2E, 3E):   (E, E)
        pad_cols(p["w1"].T),      # rows [3E, 4E):   (E, F)
        pad_cols(p["w2"].T),      # rows [4E, 4E+F): (F, E)
    ], axis=0)

    vecs = [p["b_in"], p["b_out"], p["bd"], p["b1"], p["b2"],
            p["g1"], p["be1"], p["g2"], p["be2"], p["g3"], p["be3"]]
    v_slab = jnp.concatenate([pad_cols(v.reshape(1, -1)) for v in vecs], axis=0)
    pad_rows = (-v_slab.shape[0]) % 8
    if pad_rows:
        v_slab = jnp.pad(v_slab, ((0, pad_rows), (0, 0)))
    return w_slab, v_slab


# ---------------------------------------------------------------------------
# Wrapper
# ---------------------------------------------------------------------------
def decoder_layer_forward(tgt, memory, p, nhead=NHEAD, return_attention=True):
    S, B, E = tgt.shape
    F = p["w1"].shape[0]
    N = B * S
    assert E % nhead == 0
    assert 3 * E <= LANES and F <= LANES, "packing scheme assumes 3*E <= 128 and F <= 128"

    # Wrapper-side layout plumbing only: lane-dense batch-major (B*S, E) slabs.
    x2d = jnp.transpose(tgt, (1, 0, 2)).reshape(N, E)
    m2d = jnp.transpose(memory, (1, 0, 2)).reshape(N, E)
    w_slab, v_slab = _pack_params(p)

    out_shape = [jax.ShapeDtypeStruct((N, E), tgt.dtype)]
    if return_attention:
        out_shape.append(jax.ShapeDtypeStruct((B, S, S), jnp.float32))

    # No grid: single kernel invocation, whole (tiny) arrays resident in VMEM,
    # 4 input DMAs total.
    results = pl.pallas_call(
        functools.partial(_decoder_layer_kernel,
                          batch=B, seq=S, nhead=nhead, dim_ff=F),
        out_shape=tuple(out_shape),
    )(x2d, m2d, w_slab, v_slab)

    out = results[0].reshape(B, S, E).transpose(1, 0, 2)     # back to (S, B, E)
    a_self = results[1] if return_attention else None
    return out, dict(a_self_decoder=a_self, a_cross=None)


# ---------------------------------------------------------------------------
# Deterministic parameter init (shapes per the module __init__)
# ---------------------------------------------------------------------------
def init_params(key, d_model, dim_ff):
    ks = jax.random.split(key, 8)

    def xavier(k, shape):
        fan_out, fan_in = shape
        lim = math.sqrt(6.0 / (fan_in + fan_out))
        return jax.random.uniform(k, shape, jnp.float32, -lim, lim)

    return dict(
        # MultiheadAttention in/out projections (PyTorch (out, in) layout)
        w_in=xavier(ks[0], (3 * d_model, d_model)),
        b_in=jnp.zeros((3 * d_model,), jnp.float32),
        w_out=xavier(ks[1], (d_model, d_model)),
        b_out=jnp.zeros((d_model,), jnp.float32),
        # diagonal_attn = nn.Linear(d_model, d_model)
        wd=xavier(ks[2], (d_model, d_model)),
        bd=0.02 * jax.random.normal(ks[3], (d_model,), jnp.float32),
        # FFN
        w1=xavier(ks[4], (dim_ff, d_model)),
        b1=0.02 * jax.random.normal(ks[5], (dim_ff,), jnp.float32),
        w2=xavier(ks[6], (d_model, dim_ff)),
        b2=0.02 * jax.random.normal(ks[7], (d_model,), jnp.float32),
        # LayerNorms (PyTorch default init)
        g1=jnp.ones((d_model,), jnp.float32), be1=jnp.zeros((d_model,), jnp.float32),
        g2=jnp.ones((d_model,), jnp.float32), be2=jnp.zeros((d_model,), jnp.float32),
        g3=jnp.ones((d_model,), jnp.float32), be3=jnp.zeros((d_model,), jnp.float32),
    )


# ---------------------------------------------------------------------------
# Pure-JAX reference (for correctness check)
# ---------------------------------------------------------------------------
def reference(tgt, memory, p, nhead):
    S, B, E = tgt.shape
    hd = E // nhead

    def ln(x, g, b):
        mu = x.mean(-1, keepdims=True)
        var = ((x - mu) ** 2).mean(-1, keepdims=True)
        return (x - mu) / jnp.sqrt(var + EPS) * g + b

    qkv = jnp.einsum('sbe,fe->sbf', tgt, p['w_in']) + p['b_in']
    q, k, v = jnp.split(qkv, 3, axis=-1)
    qh = q.reshape(S, B, nhead, hd).transpose(1, 2, 0, 3)
    kh = k.reshape(S, B, nhead, hd).transpose(1, 2, 0, 3)
    vh = v.reshape(S, B, nhead, hd).transpose(1, 2, 0, 3)
    s = jnp.einsum('bhqd,bhkd->bhqk', qh, kh) / math.sqrt(hd)
    pw = jax.nn.softmax(s, axis=-1)
    o = jnp.einsum('bhqk,bhkd->bhqd', pw, vh).transpose(2, 0, 1, 3).reshape(S, B, E)
    sa = jnp.einsum('sbe,fe->sbf', o, p['w_out']) + p['b_out']

    x = ln(tgt + sa, p['g1'], p['be1'])
    diag = jnp.einsum('sbe,fe->sbf', memory, p['wd']) + p['bd']
    x = ln(x + diag, p['g2'], p['be2'])
    h = jax.nn.relu(jnp.einsum('sbe,fe->sbf', x, p['w1']) + p['b1'])
    f = jnp.einsum('sbf,ef->sbe', h, p['w2']) + p['b2']
    x = ln(x + f, p['g3'], p['be3'])
    return x, pw.mean(axis=1)


if __name__ == "__main__":
    key = jax.random.PRNGKey(0)
    k_tgt, k_mem, k_par = jax.random.split(key, 3)
    params = init_params(k_par, D_MODEL, DIM_FF)

    tgt = jax.random.normal(k_tgt, (SEQ, BATCH, D_MODEL), jnp.float32)
    memory = jax.random.normal(k_mem, (SEQ, BATCH, D_MODEL), jnp.float32)

    # Full-module semantics (attention weights returned, as in PyTorch forward).
    out, attns = decoder_layer_forward(tgt, memory, params, return_attention=True)
    out = jax.block_until_ready(out)
    a_self = jax.block_until_ready(attns["a_self_decoder"])

    ref_out, ref_attn = reference(tgt, memory, params, NHEAD)
    assert jnp.allclose(out, ref_out, atol=5e-4, rtol=5e-4), "output mismatch"
    assert jnp.allclose(a_self, ref_attn, atol=2e-4, rtol=1e-3), "attn mismatch"
    assert attns["a_cross"] is None

    # Fast path: skip the attention-weights output entirely.
    out2, attns2 = decoder_layer_forward(tgt, memory, params, return_attention=False)
    out2 = jax.block_until_ready(out2)
    assert jnp.allclose(out2, ref_out, atol=5e-4, rtol=5e-4), "output mismatch (no attn)"
    assert attns2["a_self_decoder"] is None

    print("KERNEL_OK")
</pallas_src>

<mosaic_0001>
module attributes {stable_mosaic.version = 11 : i64} {
  func.func @_decoder_layer_kernel(%arg0: memref<16x32xf32, #tpu.memory_space<vmem>>, %arg1: memref<16x32xf32, #tpu.memory_space<vmem>>, %arg2: memref<192x128xf32, #tpu.memory_space<vmem>>, %arg3: memref<16x128xf32, #tpu.memory_space<vmem>>, %arg4: memref<16x32xf32, #tpu.memory_space<vmem>>, %arg5: memref<2x8x8xf32, #tpu.memory_space<vmem>>) attributes {dimension_semantics = [], scalar_prefetch = 0 : i64, scratch_operands = 0 : i64, tpu.core_type = #tpu.core_type<tc>} {
    %c0 = arith.constant 0 : index
    %c0_0 = arith.constant 0 : index
    %0 = vector.load %arg2[%c0, %c0_0] : memref<192x128xf32, #tpu.memory_space<vmem>>, vector<32x96xf32>
    %c32 = arith.constant 32 : index
    %c0_1 = arith.constant 0 : index
    %1 = vector.load %arg2[%c32, %c0_1] : memref<192x128xf32, #tpu.memory_space<vmem>>, vector<32x32xf32>
    %c64 = arith.constant 64 : index
    %c0_2 = arith.constant 0 : index
    %2 = vector.load %arg2[%c64, %c0_2] : memref<192x128xf32, #tpu.memory_space<vmem>>, vector<32x32xf32>
    %c96 = arith.constant 96 : index
    %c0_3 = arith.constant 0 : index
    %3 = vector.load %arg2[%c96, %c0_3] : memref<192x128xf32, #tpu.memory_space<vmem>>, vector<32x64xf32>
    %c128 = arith.constant 128 : index
    %c0_4 = arith.constant 0 : index
    %4 = vector.load %arg2[%c128, %c0_4] : memref<192x128xf32, #tpu.memory_space<vmem>>, vector<64x32xf32>
    %c0_5 = arith.constant 0 : index
    %c0_6 = arith.constant 0 : index
    %5 = vector.load %arg3[%c0_5, %c0_6] : memref<16x128xf32, #tpu.memory_space<vmem>>, vector<1x96xf32>
    %c1 = arith.constant 1 : index
    %c0_7 = arith.constant 0 : index
    %6 = vector.load %arg3[%c1, %c0_7] : memref<16x128xf32, #tpu.memory_space<vmem>>, vector<1x32xf32>
    %c2 = arith.constant 2 : index
    %c0_8 = arith.constant 0 : index
    %7 = vector.load %arg3[%c2, %c0_8] : memref<16x128xf32, #tpu.memory_space<vmem>>, vector<1x32xf32>
    %c3 = arith.constant 3 : index
    %c0_9 = arith.constant 0 : index
    %8 = vector.load %arg3[%c3, %c0_9] : memref<16x128xf32, #tpu.memory_space<vmem>>, vector<1x64xf32>
    %c4 = arith.constant 4 : index
    %c0_10 = arith.constant 0 : index
    %9 = vector.load %arg3[%c4, %c0_10] : memref<16x128xf32, #tpu.memory_space<vmem>>, vector<1x32xf32>
    %c5 = arith.constant 5 : index
    %c0_11 = arith.constant 0 : index
    %10 = vector.load %arg3[%c5, %c0_11] : memref<16x128xf32, #tpu.memory_space<vmem>>, vector<1x32xf32>
    %c6 = arith.constant 6 : index
    %c0_12 = arith.constant 0 : index
    %11 = vector.load %arg3[%c6, %c0_12] : memref<16x128xf32, #tpu.memory_space<vmem>>, vector<1x32xf32>
    %c7 = arith.constant 7 : index
    %c0_13 = arith.constant 0 : index
    %12 = vector.load %arg3[%c7, %c0_13] : memref<16x128xf32, #tpu.memory_space<vmem>>, vector<1x32xf32>
    %c8 = arith.constant 8 : index
    %c0_14 = arith.constant 0 : index
    %13 = vector.load %arg3[%c8, %c0_14] : memref<16x128xf32, #tpu.memory_space<vmem>>, vector<1x32xf32>
    %c9 = arith.constant 9 : index
    %c0_15 = arith.constant 0 : index
    %14 = vector.load %arg3[%c9, %c0_15] : memref<16x128xf32, #tpu.memory_space<vmem>>, vector<1x32xf32>
    %c10 = arith.constant 10 : index
    %c0_16 = arith.constant 0 : index
    %15 = vector.load %arg3[%c10, %c0_16] : memref<16x128xf32, #tpu.memory_space<vmem>>, vector<1x32xf32>
    %c0_17 = arith.constant 0 : index
    %c0_18 = arith.constant 0 : index
    %16 = vector.load %arg0[%c0_17, %c0_18] : memref<16x32xf32, #tpu.memory_space<vmem>>, vector<16x32xf32>
    %c0_19 = arith.constant 0 : index
    %c0_20 = arith.constant 0 : index
    %17 = vector.load %arg1[%c0_19, %c0_20] : memref<16x32xf32, #tpu.memory_space<vmem>>, vector<16x32xf32>
    %cst = arith.constant dense<0.000000e+00> : vector<16x96xf32>
    %18 = tpu.matmul %16, %0, %cst {dimension_numbers = #tpu.dot_dimension_numbers<[1], [0], [0], [1], [0, 0, 1, 1], [], []>} : vector<16x32xf32>, vector<32x96xf32>, vector<16x96xf32> -> vector<16x96xf32>
    %19 = vector.broadcast %5 : vector<1x96xf32> to vector<16x96xf32>
    %20 = arith.addf %18, %19 : vector<16x96xf32>
    %21 = vector.shape_cast %20 : vector<16x96xf32> to vector<2x8x96xf32>
    %22 = vector.extract_strided_slice %21 {offsets = [0, 0, 0], sizes = [2, 8, 8], strides = [1, 1, 1]} : vector<2x8x96xf32> to vector<2x8x8xf32>
    %23 = vector.extract_strided_slice %21 {offsets = [0, 0, 8], sizes = [2, 8, 8], strides = [1, 1, 1]} : vector<2x8x96xf32> to vector<2x8x8xf32>
    %24 = vector.extract_strided_slice %21 {offsets = [0, 0, 16], sizes = [2, 8, 8], strides = [1, 1, 1]} : vector<2x8x96xf32> to vector<2x8x8xf32>
    %25 = vector.extract_strided_slice %21 {offsets = [0, 0, 24], sizes = [2, 8, 8], strides = [1, 1, 1]} : vector<2x8x96xf32> to vector<2x8x8xf32>
    %26 = tpu.concatenate %22, %23, %24, %25 in 0 : vector<2x8x8xf32>, vector<2x8x8xf32>, vector<2x8x8xf32>, vector<2x8x8xf32> -> vector<8x8x8xf32>
    %cst_21 = arith.constant 0.353553385 : f32
    %27 = vector.broadcast %cst_21 : f32 to vector<8x8x8xf32>
    %28 = arith.mulf %26, %27 : vector<8x8x8xf32>
    %29 = vector.extract_strided_slice %21 {offsets = [0, 0, 32], sizes = [2, 8, 8], strides = [1, 1, 1]} : vector<2x8x96xf32> to vector<2x8x8xf32>
    %30 = vector.extract_strided_slice %21 {offsets = [0, 0, 40], sizes = [2, 8, 8], strides = [1, 1, 1]} : vector<2x8x96xf32> to vector<2x8x8xf32>
    %31 = vector.extract_strided_slice %21 {offsets = [0, 0, 48], sizes = [2, 8, 8], strides = [1, 1, 1]} : vector<2x8x96xf32> to vector<2x8x8xf32>
    %32 = vector.extract_strided_slice %21 {offsets = [0, 0, 56], sizes = [2, 8, 8], strides = [1, 1, 1]} : vector<2x8x96xf32> to vector<2x8x8xf32>
    %33 = tpu.concatenate %29, %30, %31, %32 in 0 : vector<2x8x8xf32>, vector<2x8x8xf32>, vector<2x8x8xf32>, vector<2x8x8xf32> -> vector<8x8x8xf32>
    %34 = vector.extract_strided_slice %21 {offsets = [0, 0, 64], sizes = [2, 8, 8], strides = [1, 1, 1]} : vector<2x8x96xf32> to vector<2x8x8xf32>
    %35 = vector.extract_strided_slice %21 {offsets = [0, 0, 72], sizes = [2, 8, 8], strides = [1, 1, 1]} : vector<2x8x96xf32> to vector<2x8x8xf32>
    %36 = vector.extract_strided_slice %21 {offsets = [0, 0, 80], sizes = [2, 8, 8], strides = [1, 1, 1]} : vector<2x8x96xf32> to vector<2x8x8xf32>
    %37 = vector.extract_strided_slice %21 {offsets = [0, 0, 88], sizes = [2, 8, 8], strides = [1, 1, 1]} : vector<2x8x96xf32> to vector<2x8x8xf32>
    %38 = tpu.concatenate %34, %35, %36, %37 in 0 : vector<2x8x8xf32>, vector<2x8x8xf32>, vector<2x8x8xf32>, vector<2x8x8xf32> -> vector<8x8x8xf32>
    "tpu.trace_start"() <{level = 10 : i32, message = "nqd,nkd->nqk"}> : () -> ()
    %cst_22 = arith.constant dense<0.000000e+00> : vector<8x8x8xf32>
    %39 = tpu.matmul %28, %33, %cst_22 {dimension_numbers = #tpu.dot_dimension_numbers<[2], [2], [1], [1], [0, 0, 0, 1, 1, 1], [0], [0]>} : vector<8x8x8xf32>, vector<8x8x8xf32>, vector<8x8x8xf32> -> vector<8x8x8xf32>
    "tpu.trace_stop"() : () -> ()
    %cst_23 = arith.constant dense<0xFF800000> : vector<8x8xf32>
    %40 = vector.multi_reduction <maximumf>, %39, %cst_23 [2] : vector<8x8x8xf32> to vector<8x8xf32>
    %41 = vector.shape_cast %40 : vector<8x8xf32> to vector<8x8x1xf32>
    %42 = vector.broadcast %41 : vector<8x8x1xf32> to vector<8x8x8xf32>
    %43 = arith.subf %39, %42 : vector<8x8x8xf32>
    %44 = math.exp %43 : vector<8x8x8xf32>
    %cst_24 = arith.constant dense<0.000000e+00> : vector<8x8xf32>
    %45 = vector.multi_reduction <add>, %44, %cst_24 [2] : vector<8x8x8xf32> to vector<8x8xf32>
    %46 = vector.shape_cast %45 : vector<8x8xf32> to vector<8x8x1xf32>
    %47 = tpu.reciprocal %46 {approx = true} : vector<8x8x1xf32> -> vector<8x8x1xf32>
    %48 = arith.mulf %46, %47 : vector<8x8x1xf32>
    %cst_25 = arith.constant 2.000000e+00 : f32
    %49 = vector.broadcast %cst_25 : f32 to vector<8x8x1xf32>
    %50 = arith.subf %49, %48 : vector<8x8x1xf32>
    %51 = arith.mulf %47, %50 : vector<8x8x1xf32>
    %52 = vector.broadcast %51 : vector<8x8x1xf32> to vector<8x8x8xf32>
    %53 = arith.mulf %44, %52 : vector<8x8x8xf32>
    "tpu.trace_start"() <{level = 10 : i32, message = "nqk,nkd->nqd"}> : () -> ()
    %cst_26 = arith.constant dense<0.000000e+00> : vector<8x8x8xf32>
    %54 = tpu.matmul %53, %38, %cst_26 {dimension_numbers = #tpu.dot_dimension_numbers<[2], [1], [1], [2], [0, 0, 0, 1, 1, 2], [0], [0]>} : vector<8x8x8xf32>, vector<8x8x8xf32>, vector<8x8x8xf32> -> vector<8x8x8xf32>
    "tpu.trace_stop"() : () -> ()
    %55 = vector.shape_cast %54 : vector<8x8x8xf32> to vector<4x2x8x8xf32>
    %56 = vector.extract_strided_slice %55 {offsets = [0, 0, 0, 0], sizes = [1, 2, 8, 8], strides = [1, 1, 1, 1]} : vector<4x2x8x8xf32> to vector<1x2x8x8xf32>
    %57 = vector.shape_cast %56 : vector<1x2x8x8xf32> to vector<2x8x8xf32>
    %58 = vector.extract_strided_slice %55 {offsets = [1, 0, 0, 0], sizes = [1, 2, 8, 8], strides = [1, 1, 1, 1]} : vector<4x2x8x8xf32> to vector<1x2x8x8xf32>
    %59 = vector.shape_cast %58 : vector<1x2x8x8xf32> to vector<2x8x8xf32>
    %60 = vector.extract_strided_slice %55 {offsets = [2, 0, 0, 0], sizes = [1, 2, 8, 8], strides = [1, 1, 1, 1]} : vector<4x2x8x8xf32> to vector<1x2x8x8xf32>
    %61 = vector.shape_cast %60 : vector<1x2x8x8xf32> to vector<2x8x8xf32>
    %62 = vector.extract_strided_slice %55 {offsets = [3, 0, 0, 0], sizes = [1, 2, 8, 8], strides = [1, 1, 1, 1]} : vector<4x2x8x8xf32> to vector<1x2x8x8xf32>
    %63 = vector.shape_cast %62 : vector<1x2x8x8xf32> to vector<2x8x8xf32>
    %64 = tpu.concatenate %57, %59, %61, %63 in 2 : vector<2x8x8xf32>, vector<2x8x8xf32>, vector<2x8x8xf32>, vector<2x8x8xf32> -> vector<2x8x32xf32>
    %65 = vector.shape_cast %64 : vector<2x8x32xf32> to vector<16x32xf32>
    %cst_27 = arith.constant dense<0.000000e+00> : vector<16x32xf32>
    %66 = tpu.matmul %65, %1, %cst_27 {dimension_numbers = #tpu.dot_dimension_numbers<[1], [0], [0], [1], [0, 0, 1, 1], [], []>} : vector<16x32xf32>, vector<32x32xf32>, vector<16x32xf32> -> vector<16x32xf32>
    %67 = vector.broadcast %6 : vector<1x32xf32> to vector<16x32xf32>
    %68 = arith.addf %66, %67 : vector<16x32xf32>
    %69 = arith.addf %16, %68 : vector<16x32xf32>
    %cst_28 = arith.constant dense<0.000000e+00> : vector<16xf32>
    %70 = vector.multi_reduction <add>, %69, %cst_28 [1] : vector<16x32xf32> to vector<16xf32>
    %71 = vector.shape_cast %70 : vector<16xf32> to vector<16x1xf32>
    %cst_29 = arith.constant 3.200000e+01 : f32
    %72 = vector.broadcast %cst_29 : f32 to vector<16x1xf32>
    %73 = arith.divf %71, %72 : vector<16x1xf32>
    %74 = vector.broadcast %73 : vector<16x1xf32> to vector<16x32xf32>
    %75 = arith.subf %69, %74 : vector<16x32xf32>
    %76 = arith.mulf %75, %75 : vector<16x32xf32>
    %cst_30 = arith.constant dense<0.000000e+00> : vector<16xf32>
    %77 = vector.multi_reduction <add>, %76, %cst_30 [1] : vector<16x32xf32> to vector<16xf32>
    %78 = vector.shape_cast %77 : vector<16xf32> to vector<16x1xf32>
    %cst_31 = arith.constant 3.200000e+01 : f32
    %79 = vector.broadcast %cst_31 : f32 to vector<16x1xf32>
    %80 = arith.divf %78, %79 : vector<16x1xf32>
    %cst_32 = arith.constant 9.99999974E-6 : f32
    %81 = vector.broadcast %cst_32 : f32 to vector<16x1xf32>
    %82 = arith.addf %80, %81 : vector<16x1xf32>
    %83 = math.rsqrt %82 : vector<16x1xf32>
    %84 = vector.broadcast %83 : vector<16x1xf32> to vector<16x32xf32>
    %85 = arith.mulf %75, %84 : vector<16x32xf32>
    %86 = vector.broadcast %10 : vector<1x32xf32> to vector<16x32xf32>
    %87 = arith.mulf %85, %86 : vector<16x32xf32>
    %88 = vector.broadcast %11 : vector<1x32xf32> to vector<16x32xf32>
    %89 = arith.addf %87, %88 : vector<16x32xf32>
    %cst_33 = arith.constant dense<0.000000e+00> : vector<16x32xf32>
    %90 = tpu.matmul %17, %2, %cst_33 {dimension_numbers = #tpu.dot_dimension_numbers<[1], [0], [0], [1], [0, 0, 1, 1], [], []>} : vector<16x32xf32>, vector<32x32xf32>, vector<16x32xf32> -> vector<16x32xf32>
    %91 = vector.broadcast %7 : vector<1x32xf32> to vector<16x32xf32>
    %92 = arith.addf %90, %91 : vector<16x32xf32>
    %93 = arith.addf %89, %92 : vector<16x32xf32>
    %cst_34 = arith.constant dense<0.000000e+00> : vector<16xf32>
    %94 = vector.multi_reduction <add>, %93, %cst_34 [1] : vector<16x32xf32> to vector<16xf32>
    %95 = vector.shape_cast %94 : vector<16xf32> to vector<16x1xf32>
    %cst_35 = arith.constant 3.200000e+01 : f32
    %96 = vector.broadcast %cst_35 : f32 to vector<16x1xf32>
    %97 = arith.divf %95, %96 : vector<16x1xf32>
    %98 = vector.broadcast %97 : vector<16x1xf32> to vector<16x32xf32>
    %99 = arith.subf %93, %98 : vector<16x32xf32>
    %100 = arith.mulf %99, %99 : vector<16x32xf32>
    %cst_36 = arith.constant dense<0.000000e+00> : vector<16xf32>
    %101 = vector.multi_reduction <add>, %100, %cst_36 [1] : vector<16x32xf32> to vector<16xf32>
    %102 = vector.shape_cast %101 : vector<16xf32> to vector<16x1xf32>
    %cst_37 = arith.constant 3.200000e+01 : f32
    %103 = vector.broadcast %cst_37 : f32 to vector<16x1xf32>
    %104 = arith.divf %102, %103 : vector<16x1xf32>
    %cst_38 = arith.constant 9.99999974E-6 : f32
    %105 = vector.broadcast %cst_38 : f32 to vector<16x1xf32>
    %106 = arith.addf %104, %105 : vector<16x1xf32>
    %107 = math.rsqrt %106 : vector<16x1xf32>
    %108 = vector.broadcast %107 : vector<16x1xf32> to vector<16x32xf32>
    %109 = arith.mulf %99, %108 : vector<16x32xf32>
    %110 = vector.broadcast %12 : vector<1x32xf32> to vector<16x32xf32>
    %111 = arith.mulf %109, %110 : vector<16x32xf32>
    %112 = vector.broadcast %13 : vector<1x32xf32> to vector<16x32xf32>
    %113 = arith.addf %111, %112 : vector<16x32xf32>
    %cst_39 = arith.constant dense<0.000000e+00> : vector<16x64xf32>
    %114 = tpu.matmul %113, %3, %cst_39 {dimension_numbers = #tpu.dot_dimension_numbers<[1], [0], [0], [1], [0, 0, 1, 1], [], []>} : vector<16x32xf32>, vector<32x64xf32>, vector<16x64xf32> -> vector<16x64xf32>
    %115 = vector.broadcast %8 : vector<1x64xf32> to vector<16x64xf32>
    %116 = arith.addf %114, %115 : vector<16x64xf32>
    %cst_40 = arith.constant 0.000000e+00 : f32
    %117 = vector.broadcast %cst_40 : f32 to vector<16x64xf32>
    %118 = arith.maximumf %116, %117 : vector<16x64xf32>
    %cst_41 = arith.constant dense<0.000000e+00> : vector<16x32xf32>
    %119 = tpu.matmul %118, %4, %cst_41 {dimension_numbers = #tpu.dot_dimension_numbers<[1], [0], [0], [1], [0, 0, 1, 1], [], []>} : vector<16x64xf32>, vector<64x32xf32>, vector<16x32xf32> -> vector<16x32xf32>
    %120 = vector.broadcast %9 : vector<1x32xf32> to vector<16x32xf32>
    %121 = arith.addf %119, %120 : vector<16x32xf32>
    %122 = arith.addf %113, %121 : vector<16x32xf32>
    %cst_42 = arith.constant dense<0.000000e+00> : vector<16xf32>
    %123 = vector.multi_reduction <add>, %122, %cst_42 [1] : vector<16x32xf32> to vector<16xf32>
    %124 = vector.shape_cast %123 : vector<16xf32> to vector<16x1xf32>
    %cst_43 = arith.constant 3.200000e+01 : f32
    %125 = vector.broadcast %cst_43 : f32 to vector<16x1xf32>
    %126 = arith.divf %124, %125 : vector<16x1xf32>
    %127 = vector.broadcast %126 : vector<16x1xf32> to vector<16x32xf32>
    %128 = arith.subf %122, %127 : vector<16x32xf32>
    %129 = arith.mulf %128, %128 : vector<16x32xf32>
    %cst_44 = arith.constant dense<0.000000e+00> : vector<16xf32>
    %130 = vector.multi_reduction <add>, %129, %cst_44 [1] : vector<16x32xf32> to vector<16xf32>
    %131 = vector.shape_cast %130 : vector<16xf32> to vector<16x1xf32>
    %cst_45 = arith.constant 3.200000e+01 : f32
    %132 = vector.broadcast %cst_45 : f32 to vector<16x1xf32>
    %133 = arith.divf %131, %132 : vector<16x1xf32>
    %cst_46 = arith.constant 9.99999974E-6 : f32
    %134 = vector.broadcast %cst_46 : f32 to vector<16x1xf32>
    %135 = arith.addf %133, %134 : vector<16x1xf32>
    %136 = math.rsqrt %135 : vector<16x1xf32>
    %137 = vector.broadcast %136 : vector<16x1xf32> to vector<16x32xf32>
    %138 = arith.mulf %128, %137 : vector<16x32xf32>
    %139 = vector.broadcast %14 : vector<1x32xf32> to vector<16x32xf32>
    %140 = arith.mulf %138, %139 : vector<16x32xf32>
    %141 = vector.broadcast %15 : vector<1x32xf32> to vector<16x32xf32>
    %142 = arith.addf %140, %141 : vector<16x32xf32>
    %c0_47 = arith.constant 0 : index
    %c0_48 = arith.constant 0 : index
    %143 = vector.load %arg4[%c0_47, %c0_48] : memref<16x32xf32, #tpu.memory_space<vmem>>, vector<16x32xf32>
    tpu.vector_store %arg4[%c0_47, %c0_48], %142 {strides = array<i32>} : memref<16x32xf32, #tpu.memory_space<vmem>>, vector<16x32xf32>,
    %144 = vector.shape_cast %53 : vector<8x8x8xf32> to vector<4x2x8x8xf32>
    %cst_49 = arith.constant dense<0.000000e+00> : vector<2x8x8xf32>
    %145 = vector.multi_reduction <add>, %144, %cst_49 [0] : vector<4x2x8x8xf32> to vector<2x8x8xf32>
    %cst_50 = arith.constant 4.000000e+00 : f32
    %146 = vector.broadcast %cst_50 : f32 to vector<2x8x8xf32>
    %147 = arith.divf %145, %146 : vector<2x8x8xf32>
    %c0_51 = arith.constant 0 : index
    %c0_52 = arith.constant 0 : index
    %c0_53 = arith.constant 0 : index
    %148 = vector.load %arg5[%c0_51, %c0_52, %c0_53] : memref<2x8x8xf32, #tpu.memory_space<vmem>>, vector<2x8x8xf32>
    tpu.vector_store %arg5[%c0_51, %c0_52, %c0_53], %147 {strides = array<i32>} : memref<2x8x8xf32, #tpu.memory_space<vmem>>, vector<2x8x8xf32>,
    return
  }
}

</mosaic_0001>

<bundles_post_ra>
// kernel: tpu_custom_call.1
= control target key start
LH: loop header
LB: loop body
LE: loop exit
PB: predicated region body
PF: predicated region fallthrough
CT: control target
= control target key end

     0   :  { %11 = vsyncpa [#allocation3], 0  ;;  %s2999_s0 = inlined_call_operand.hbm [shape: f32[16,32], index: 0, kind: input, shape index: {}]   ;;  %s3000_s1 = inlined_call_operand.hbm [shape: f32[16,32], index: 1, kind: input, shape index: {}]   ;;  %s3001_s2 = inlined_call_operand.hbm [shape: f32[192,128], index: 2, kind: input, shape index: {}]   ;;  %s3002_s3 = inlined_call_operand.hbm [shape: f32[16,128], index: 3, kind: input, shape index: {}]   ;;  %s3003_s4 = inlined_call_operand.hbm [shape: f32[16,32], index: 4, kind: output, shape index: {0}]   ;;  %s3004_s5 = inlined_call_operand.hbm [shape: f32[2,8,8], index: 5, kind: output, shape index: {1}]  }
   0x1   :  { %12 = vsyncpa [#allocation6], 0 }
   0x2   :  { %13 = vsyncpa [#allocation9], 0 }
   0x3   :  { %14 = vsyncpa [#allocation4], 0 }
   0x4   :  { %15 = vsyncpa [#allocation12], 0  ;;  %s2623_s18 = smov [#allocation5]   ;;  %s2624_s20 = smov [#allocation2]  }
   0x5   :  { %s33_s19 = sshll.u32 %s2623_s18, 4  ;;  %s21_s21 = sshll.u32 %s2624_s20, 4  ;;  %s34_s19 = int_to_ptr.vmem [resolvable:$true] %s33_s19  ;;  %s2670_s21 = int_to_ptr.vmem [resolvable:$true] %s21_s21 }
   0x6   :  { %s2481_s24 = scalar_lea.hbm %s3000_s1, 256 }
   0x7   :  { %p2482_p0 = scmp.ne.s32.totalorder %s3000_s1, %s2481_s24  ;;  %p2485_p1 = scmp.lt.u32.totalorder %s2481_s24, %s3000_s1 }
   0x9   :  { %p2487_p2 = pnand %p2485_p1, %p2482_p0 }
   0xb   :  { %2490 = shalt.err (!%p2487_p2)
}
   0xc   :  { %s2491_s29 = scalar_lea.vmem %s34_s19, 256  ;;  %p2496_p4 = scmp.lt.s32.totalorder %s34_s19, %s34_s19 }
   0xd   :  { %p2492_p3 = scmp.ne.s32.totalorder %s34_s19, %s2491_s29  ;;  %p2497_p5 = scmp.lt.s32.totalorder %s2491_s29, %s2491_s29 }
   0xf   :  { %p2498_p6 = por %p2497_p5, %p2496_p4 }
  0x11   :  { %p2499_p7 = pnand %p2498_p6, %p2492_p3 }
  0x13   :  { %2502 = shalt.err (!%p2499_p7)
}
  0x14   :  { %s2625_s30 = smov 128   ;;  %s2626_s6 = smov 8  }
  0x15   :  { %39 = dma.hbm_to_vmem [thread:$0]  %s3000_s1, 256, %s34_s19, [#allocation6], %s2625_s30, %s2625_s30, %s2626_s6  }
  0x16   :  { %s2503_s11 = scalar_lea.hbm %s2999_s0, 256 }
  0x17   :  { %p2504_p8 = scmp.ne.s32.totalorder %s2999_s0, %s2503_s11  ;;  %p2507_p9 = scmp.lt.u32.totalorder %s2503_s11, %s2999_s0 }
  0x19   :  { %p2509_p10 = pnand %p2507_p9, %p2504_p8 }
  0x1b   :  { %2512 = shalt.err (!%p2509_p10)
}
  0x1c   :  { %s2513_s16 = scalar_lea.vmem %s2670_s21, 256  ;;  %p2518_p12 = scmp.lt.s32.totalorder %s2670_s21, %s2670_s21 }
  0x1d   :  { %p2514_p11 = scmp.ne.s32.totalorder %s2670_s21, %s2513_s16  ;;  %p2519_p13 = scmp.lt.s32.totalorder %s2513_s16, %s2513_s16 }
  0x1f   :  { %p2520_p0 = por %p2519_p13, %p2518_p12 }
  0x21   :  { %p2521_p1 = pnand %p2520_p0, %p2514_p11 }
  0x23   :  { %2524 = shalt.err (!%p2521_p1)
}
  0x24   :  { %27 = dma.hbm_to_vmem [thread:$0]  %s2999_s0, 256, %s2670_s21, [#allocation3], %s2625_s30, %s2625_s30, %s2626_s6  }
  0x25   :  { %s2627_s18 = smov [#allocation7]   ;;  %s2628_s20 = smov [#allocation8]  }
  0x26   :  { %s45_s19 = sshll.u32 %s2627_s18, 4  ;;  %s57_s22 = sshll.u32 %s2628_s20, 4  ;;  %s46_s19 = int_to_ptr.vmem [resolvable:$true] %s45_s19  ;;  %s2707_s22 = int_to_ptr.vmem [resolvable:$true] %s57_s22 }
  0x27   :  { %s2525_s25 = scalar_lea.hbm %s3001_s2, 3072 }
  0x28   :  { %p2526_p2 = scmp.ne.s32.totalorder %s3001_s2, %s2525_s25  ;;  %p2529_p3 = scmp.lt.u32.totalorder %s2525_s25, %s3001_s2 }
  0x2a   :  { %p2531_p4 = pnand %p2529_p3, %p2526_p2 }
  0x2c   :  { %2534 = shalt.err (!%p2531_p4)
}
  0x2d   :  { %s2535_s0 = scalar_lea.vmem %s46_s19, 3072  ;;  %p2540_p6 = scmp.lt.s32.totalorder %s46_s19, %s46_s19 }
  0x2e   :  { %p2536_p5 = scmp.ne.s32.totalorder %s46_s19, %s2535_s0  ;;  %p2541_p7 = scmp.lt.s32.totalorder %s2535_s0, %s2535_s0 }
  0x30   :  { %p2542_p8 = por %p2541_p7, %p2540_p6 }
  0x32   :  { %p2543_p9 = pnand %p2542_p8, %p2536_p5 }
  0x34   :  { %2546 = shalt.err (!%p2543_p9)
}
  0x35   :  { %51 = dma.hbm_to_vmem [thread:$0]  %s3001_s2, 3072, %s46_s19, [#allocation6], %s2625_s30, %s2625_s30, %s2626_s6  }
  0x36   :  { %s2547_s10 = scalar_lea.hbm %s3002_s3, 256 }
  0x37   :  { %p2548_p10 = scmp.ne.s32.totalorder %s3002_s3, %s2547_s10  ;;  %p2551_p11 = scmp.lt.u32.totalorder %s2547_s10, %s3002_s3 }
  0x39   :  { %p2553_p12 = pnand %p2551_p11, %p2548_p10 }
  0x3b   :  { %2556 = shalt.err (!%p2553_p12)
}
  0x3c   :  { %s2557_s15 = scalar_lea.vmem %s2707_s22, 256  ;;  %p2562_p0 = scmp.lt.s32.totalorder %s2707_s22, %s2707_s22 }
  0x3d   :  { %p2558_p13 = scmp.ne.s32.totalorder %s2707_s22, %s2557_s15  ;;  %p2563_p1 = scmp.lt.s32.totalorder %s2557_s15, %s2557_s15 }
  0x3f   :  { %p2564_p2 = por %p2563_p1, %p2562_p0 }
  0x41   :  { %p2565_p3 = pnand %p2564_p2, %p2558_p13 }
  0x43   :  { %2568 = shalt.err (!%p2565_p3)
}
  0x44   :  { %63 = dma.hbm_to_vmem [thread:$0]  %s3002_s3, 256, %s2707_s22, [#allocation9], %s2625_s30, %s2625_s30, %s2626_s6  }
  0x45   :  { %2613 = dma.done.wait [#allocation3], 256  }
  0x46   :  { %2614 = vsyncadd [#allocation3], 4294967040 }
  0x47   :  { %2615 = dma.done.wait [#allocation6], 3328  }
  0x48   :  { %2616 = vsyncadd [#allocation6], 4294963968 }
  0x49   :  { %2617 = dma.done.wait [#allocation9], 256  }
  0x4a   :  { %2618 = vsyncadd [#allocation9], 4294967040  ;;  %vm119_vm0 = vcmask 261120   ;;  %v76_v0 = vld [vmem:[#allocation7] sm:$0xff]  ;;  %v77_v1 = vld [vmem:[#allocation7 + $0x8] sm:$0xff]  ;;  %v2629_v10 = vmov 0.0  }
  0x4b   :  { %v78_v2 = vld [vmem:[#allocation7 + $0x10] sm:$0xff]  ;;  %v2372_v3 = vpack.c.bf16 %v77_v1, %v76_v0  ;;  %v79_v4 = vld [vmem:[#allocation7 + $0x18] sm:$0xff]  ;;  %v2744_v5 = vld [vmem:[#allocation2] sm:$0xff]  ;;  %2245 = vmatprep.subr.mxu1 %v2629_v10  ;;  %s2630_s3 = smov 112   ;;  %s2631_s1 = smov 120   ;;  %vm2632_vm1 = vmmov 0  }
  0x4c   :  { %v2376_v6 = vpack.c.bf16 %v79_v4, %v78_v2  ;;  %2237 = vmatprep.mubr.msk.f32.mxu0 %vm119_vm0, %v2744_v5  ;;  %v2748_v7 = vld [vmem:[#allocation2 + $0x8] sm:$0xff]  ;;  %v2118_v8 = vld [vmem:[#allocation8] ss:$0 sm:$0xff]  ;;  %2247 = vmatprep.mubr.msk.f32.mxu1 %vm2632_vm1, %v2629_v10  ;;  %s2633_s17 = smov 104   ;;  %s2634_s18 = smov 96   ;;  %vm231_vm2 = vcmask 64512  }
  0x4d   :  { %2373 = vmatprep.subr.bf16.mxu0 %v2372_v3  ;;  %s2635_s19 = smov 64   ;;  %s2636_s20 = smov 16   ;;  %vm1592_vm3 = vcmask 130048   ;;  %vm1595_vm4 = vcmask 195584   ;;  %vm1940_vm5 = vcmask 523264  }
  0x4e   :  { %2375 = vmatpush3.bf16.msra.mxu0 %v2372_v3  ;;  %s2637_s22 = smov 24   ;;  %s2638_s23 = smov [#allocation11]  }
  0x4f   :  { %2377 = vmatprep.subr.bf16.mxu0 %v2376_v6  ;;  %s2100_s24 = sshll.u32 %s2638_s23, 4  ;;  %s2101_s24 = int_to_ptr.vmem [resolvable:$true] %s2100_s24 }
  0x50   :  { %s2569_s25 = scalar_lea.vmem %s2101_s24, 256  ;;  %p2574_p5 = scmp.lt.s32.totalorder %s2101_s24, %s2101_s24 }
  0x51   :  { %p2570_p4 = scmp.ne.s32.totalorder %s2101_s24, %s2569_s25  ;;  %p2575_p6 = scmp.lt.s32.totalorder %s2569_s25, %s2569_s25 }
  0x52   :  { %2379 = vmatpush3.bf16.msra.mxu0 %v2376_v6 }
  0x53   :  { %2240 = vmatprep.subr.mxu0 %v2629_v10  ;;  %p2576_p7 = por %p2575_p6, %p2574_p5 }
  0x55   :  { %2238 = vmatmul.mubr.msk.f32.vlgmr.msra.gmra.mrb[0].mxu0 %vm119_vm0, %v2748_v7  ;;  %p2577_p8 = pnand %p2576_p7, %p2570_p4 }
  0x56   :  { %2242 = vmatprep.mubr.msk.f32.mxu0 %vm2632_vm1, %v2629_v10 }
 0x128   :  { %v2239_v9 = vpop.f32.mrb[0].mxu0 }
 0x129   :  { %v192_v11 = vpop.f32.mrb[1].mxu0  ;;  %v2762_v13 = vadd.f32 %v2239_v9, %v2118_v8 }
 0x12a   :  { %v2754_v12 = vadd.f32 %v2118_v8, %v192_v11 }
 0x12b   :  { %v222_v22 = vmul.f32 0.35355338, %v2762_v13 }
 0x12c   :  { %209 = vrot.lane.b32.xlu1 %v2754_v12, %s2630_s3  ;;  %203 = vrot.lane.b32.xlu0 %v2754_v12, %s2631_s1  ;;  %v221_v23 = vmul.f32 0.35355338, %v2754_v12 }
 0x130   :  { %211 = vrot.lane.b32.xlu1 %v2762_v13, %s2630_s3  ;;  %205 = vrot.lane.b32.xlu0 %v2762_v13, %s2631_s1 }
 0x134   :  { %217 = vrot.lane.b32.xlu1 %v2762_v13, %s2633_s17  ;;  %215 = vrot.lane.b32.xlu0 %v2754_v12, %s2633_s17 }
 0x138   :  { %307 = vrot.lane.b32.xlu1 %v2762_v13, %s2634_s18  ;;  %229 = vrot.lane.b32.xlu0 %v2754_v12, %s2634_s18 }
 0x19e   :  { %v2770_v14 = vpop.permute.xlu1 %209  ;;  %v2772_v15 = vpop.permute.xlu0 %203 }
 0x19f   :  { %384 = vrot.lane.b32.xlu0 %v2772_v15, %s2634_s18  ;;  %v223_v25 = vmul.f32 0.35355338, %v2772_v15  ;;  %v225_v28 = vmul.f32 0.35355338, %v2770_v14 }
 0x1a2   :  { %v2775_v16 = vpop.permute.xlu1 %211  ;;  %v2777_v17 = vpop.permute.xlu0 %205 }
 0x1a3   :  { %538 = vrot.lane.b32.xlu0 %v2770_v14, %s2634_s18  ;;  %461 = vrot.lane.b32.xlu1 %v2777_v17, %s2634_s18  ;;  %v224_v29 = vmul.f32 0.35355338, %v2777_v17  ;;  %v226_v32 = vmul.f32 0.35355338, %v2775_v16 }
 0x1a6   :  { %v2781_v18 = vpop.permute.xlu1 %217  ;;  %v2783_v19 = vpop.permute.xlu0 %215 }
 0x1a7   :  { %615 = vrot.lane.b32.xlu1 %v2775_v16, %s2634_s18  ;;  %692 = vrot.lane.b32.xlu0 %v2783_v19, %s2634_s18  ;;  %v227_v33 = vmul.f32 0.35355338, %v2783_v19  ;;  %v228_v35 = vmul.f32 0.35355338, %v2781_v18 }
 0x1aa   :  { %v308_v20 = vpop.permute.xlu1 %307  ;;  %v230_v21 = vpop.permute.xlu0 %229 }
 0x1ab   :  { %2246 = vmatpush3.xpose.msk.msra.mxu1 %vm231_vm2, %v308_v20  ;;  %769 = vrot.lane.b32.xlu1 %v2781_v18, %s2634_s18 }
 0x1ac   :  { %2241 = vmatpush3.xpose.msk.msra.mxu0 %vm231_vm2, %v230_v21  ;;  %2255 = vmatprep.subr.mxu1 %v2629_v10 }
 0x1ad   :  { %2250 = vmatprep.subr.mxu0 %v2629_v10 }
 0x1ae   :  { %2248 = vmatmul.mubr.msk.f32.vlgmr.msra.gmra.mrb[0].mxu1 %vm231_vm2, %v222_v22 }
 0x1af   :  { %2243 = vmatmul.mubr.msk.f32.vlgmr.msra.gmra.mrb[2].mxu0 %vm231_vm2, %v221_v23  ;;  %2257 = vmatprep.mubr.msk.f32.mxu1 %vm2632_vm1, %v2629_v10 }
 0x1b0   :  { %2252 = vmatprep.mubr.msk.f32.mxu0 %vm2632_vm1, %v2629_v10 }
 0x211   :  { %v385_v24 = vpop.permute.xlu0 %384 }
 0x212   :  { %2251 = vmatpush3.xpose.msk.msra.mxu0 %vm231_vm2, %v385_v24 }
 0x213   :  { %2260 = vmatprep.subr.mxu0 %v2629_v10 }
 0x215   :  { %v462_v26 = vpop.permute.xlu1 %461  ;;  %v539_v27 = vpop.permute.xlu0 %538  ;;  %2253 = vmatmul.mubr.msk.f32.vlgmr.msra.gmra.mrb[4].mxu0 %vm231_vm2, %v223_v25 }
 0x216   :  { %2256 = vmatpush3.xpose.msk.msra.mxu1 %vm231_vm2, %v462_v26  ;;  %2261 = vmatpush3.xpose.msk.msra.mxu0 %vm231_vm2, %v539_v27 }
 0x217   :  { %2262 = vmatprep.mubr.msk.f32.mxu0 %vm2632_vm1, %v2629_v10  ;;  %2265 = vmatprep.subr.mxu1 %v2629_v10 }
 0x218   :  { %2270 = vmatprep.subr.mxu0 %v2629_v10 }
 0x219   :  { %2258 = vmatmul.mubr.msk.f32.vlgmr.msra.gmra.mrb[2].mxu1 %vm231_vm2, %v224_v29  ;;  %v616_v30 = vpop.permute.xlu1 %615  ;;  %v693_v31 = vpop.permute.xlu0 %692  ;;  %2263 = vmatmul.mubr.msk.f32.vlgmr.msra.gmra.mrb[6].mxu0 %vm231_vm2, %v225_v28 }
 0x21a   :  { %2266 = vmatpush3.xpose.msk.msra.mxu1 %vm231_vm2, %v616_v30  ;;  %2271 = vmatpush3.xpose.msk.msra.mxu0 %vm231_vm2, %v693_v31 }
 0x21b   :  { %2267 = vmatprep.mubr.msk.f32.mxu1 %vm2632_vm1, %v2629_v10  ;;  %2272 = vmatprep.mubr.msk.f32.mxu0 %vm2632_vm1, %v2629_v10 }
 0x21c   :  { %2275 = vmatprep.subr.mxu1 %v2629_v10  ;;  %2280 = vmatprep.subr.mxu0 %v2629_v10 }
 0x21d   :  { %2268 = vmatmul.mubr.msk.f32.vlgmr.msra.gmra.mrb[4].mxu1 %vm231_vm2, %v226_v32  ;;  %v770_v34 = vpop.permute.xlu1 %769  ;;  %2273 = vmatmul.mubr.msk.f32.vlgmr.msra.gmra.mrb[8].mxu0 %vm231_vm2, %v227_v33 }
 0x21e   :  { %2276 = vmatpush3.xpose.msk.msra.mxu1 %vm231_vm2, %v770_v34  ;;  %2277 = vmatprep.mubr.msk.f32.mxu1 %vm2632_vm1, %v2629_v10 }
 0x21f   :  { %2285 = vmatprep.subr.mxu1 %v2629_v10  ;;  %2282 = vmatprep.mubr.msk.f32.mxu0 %vm2632_vm1, %v2629_v10 }
 0x221   :  { %2278 = vmatmul.mubr.msk.f32.vlgmr.msra.gmra.mrb[6].mxu1 %vm231_vm2, %v228_v35 }
 0x222   :  { %2287 = vmatprep.mubr.msk.f32.mxu1 %vm2632_vm1, %v2629_v10 }
 0x281   :  { %v380_v36 = vpop.f32.mrb[0].mxu1 }
 0x282   :  { %v303_v37 = vpop.f32.mrb[2].mxu0  ;;  %v2249_v38 = vpop.f32.mrb[1].mxu1  ;;  %v849_v39 = vsel %vm231_vm2, %v380_v36, -inf }
 0x283   :  { %v2244_v40 = vpop.f32.mrb[3].mxu0  ;;  %850 = vmax.xlane.f32.xlu1 %v849_v39  ;;  %v846_v41 = vsel %vm231_vm2, %v303_v37, -inf }
 0x284   :  { %847 = vmax.xlane.f32.xlu0 %v846_v41 }
 0x2e8   :  { %v457_v42 = vpop.f32.mrb[4].mxu0 }
 0x2e9   :  { %v2254_v43 = vpop.f32.mrb[5].mxu0  ;;  %v852_v44 = vsel %vm231_vm2, %v457_v42, -inf }
 0x2ea   :  { %853 = vmax.xlane.f32.xlu0 %v852_v44 }
 0x2ec   :  { %v534_v45 = vpop.f32.mrb[2].mxu1  ;;  %v611_v46 = vpop.f32.mrb[6].mxu0 }
 0x2ed   :  { %v2259_v47 = vpop.f32.mrb[3].mxu1  ;;  %v2264_v48 = vpop.f32.mrb[7].mxu0  ;;  %v855_v49 = vsel %vm231_vm2, %v534_v45, -inf  ;;  %v858_v50 = vsel %vm231_vm2, %v611_v46, -inf }
 0x2ee   :  { %856 = vmax.xlane.f32.xlu0 %v855_v49  ;;  %859 = vmax.xlane.f32.xlu1 %v858_v50 }
 0x2f0   :  { %v688_v51 = vpop.f32.mrb[4].mxu1  ;;  %v765_v52 = vpop.f32.mrb[8].mxu0 }
 0x2f1   :  { %v2269_v53 = vpop.f32.mrb[5].mxu1  ;;  %v2274_v54 = vpop.f32.mrb[9].mxu0  ;;  %v861_v55 = vsel %vm231_vm2, %v688_v51, -inf  ;;  %v864_v56 = vsel %vm231_vm2, %v765_v52, -inf }
 0x2f2   :  { %862 = vmax.xlane.f32.xlu0 %v861_v55  ;;  %865 = vmax.xlane.f32.xlu1 %v864_v56 }
 0x2f4   :  { %v842_v57 = vpop.f32.mrb[6].mxu1 }
 0x2f5   :  { %v2279_v58 = vpop.f32.mrb[7].mxu1  ;;  %v867_v59 = vsel %vm231_vm2, %v842_v57, -inf }
 0x2f6   :  { %868 = vmax.xlane.f32.xlu0 %v867_v59 }
 0x303   :  { %958 = vrot.lane.b32.xlu1 %v2754_v12, %s2635_s19 }
 0x307   :  { %1110 = vrot.lane.b32.xlu1 %v2772_v15, %s2635_s19 }
 0x30b   :  { %1186 = vrot.lane.b32.xlu1 %v2777_v17, %s2635_s19 }
 0x30c   :  { %1034 = vrot.lane.b32.xlu0 %v2762_v13, %s2635_s19 }
 0x30f   :  { %1338 = vrot.lane.b32.xlu1 %v2775_v16, %s2635_s19 }
 0x310   :  { %1262 = vrot.lane.b32.xlu0 %v2770_v14, %s2635_s19  ;;  %v851_v60 = vpop.xlane.xlu1 %850 }
 0x311   :  { %v871_v61 = vsub.f32 %v380_v36, %v851_v60  ;;  %v848_v62 = vpop.xlane.xlu0 %847 }
 0x312   :  { %v870_v0 = vsub.f32 %v303_v37, %v848_v62 }
 0x313   :  { %v880_v63 = vmul.f32 1.442695, %v871_v61 }
 0x314   :  { %v878_v1 = vmul.f32 1.442695, %v870_v0 }
 0x315   :  { %2437 = vpow2.f32 %v880_v63 }
 0x316   :  { %2439 = vpow2.f32 %v878_v1 }
 0x31f   :  { %v2856_v2 = vpop.eup %2437 }
 0x320   :  { %v897_v3 = vsel %vm231_vm2, %v2856_v2, 0.0  ;;  %v2860_v4 = vpop.eup %2439 }
 0x321   :  { %v894_v6 = vsel %vm231_vm2, %v2860_v4, 0.0 }
 0x32f   :  { %898 = vadd.xlane.f32.xlu0 %v897_v3 }
 0x333   :  { %895 = vadd.xlane.f32.xlu1 %v894_v6 }
 0x377   :  { %v854_v8 = vpop.xlane.xlu0 %853 }
 0x378   :  { %v872_v9 = vsub.f32 %v457_v42, %v854_v8 }
 0x37a   :  { %v882_v11 = vmul.f32 1.442695, %v872_v9 }
 0x37b   :  { %v857_v12 = vpop.xlane.xlu0 %856  ;;  %v860_v13 = vpop.xlane.xlu1 %859 }
 0x37c   :  { %2441 = vpow2.f32 %v882_v11  ;;  %v873_v14 = vsub.f32 %v534_v45, %v857_v12  ;;  %v874_v15 = vsub.f32 %v611_v46, %v860_v13 }
 0x37e   :  { %v884_v16 = vmul.f32 1.442695, %v873_v14  ;;  %v886_v17 = vmul.f32 1.442695, %v874_v15 }
 0x37f   :  { %v863_v20 = vpop.xlane.xlu0 %862  ;;  %v866_v21 = vpop.xlane.xlu1 %865 }
 0x380   :  { %2443 = vpow2.f32 %v884_v16  ;;  %v875_v22 = vsub.f32 %v688_v51, %v863_v20  ;;  %v876_v23 = vsub.f32 %v765_v52, %v866_v21 }
 0x381   :  { %2445 = vpow2.f32 %v886_v17 }
 0x382   :  { %v888_v24 = vmul.f32 1.442695, %v875_v22  ;;  %v890_v25 = vmul.f32 1.442695, %v876_v23 }
 0x383   :  { %v869_v26 = vpop.xlane.xlu0 %868  ;;  %v959_v27 = vpop.permute.xlu1 %958 }
 0x384   :  { %2447 = vpow2.f32 %v888_v24  ;;  %v877_v28 = vsub.f32 %v842_v57, %v869_v26  ;;  %2281 = vmatpush3.msra.mxu0 %v959_v27 }
 0x385   :  { %2449 = vpow2.f32 %v890_v25  ;;  %2290 = vmatprep.subr.mxu0 %v2629_v10 }
 0x386   :  { %v2865_v29 = vpop.eup %2441  ;;  %v892_v30 = vmul.f32 1.442695, %v877_v28 }
 0x387   :  { %v1035_v31 = vpop.permute.xlu0 %1034  ;;  %v900_v32 = vsel %vm231_vm2, %v2865_v29, 0.0  ;;  %v1111_v43 = vpop.permute.xlu1 %1110 }
 0x388   :  { %2451 = vpow2.f32 %v892_v30  ;;  %2286 = vmatpush3.msra.mxu1 %v1035_v31  ;;  %901 = vadd.xlane.f32.xlu1 %v900_v32 }
 0x389   :  { %2295 = vmatprep.subr.mxu1 %v2629_v10 }
 0x38a   :  { %v2870_v33 = vpop.eup %2443 }
 0x38b   :  { %v2872_v34 = vpop.eup %2445  ;;  %v903_v35 = vsel %vm231_vm2, %v2870_v33, 0.0  ;;  %v1187_v44 = vpop.permute.xlu1 %1186 }
 0x38c   :  { %904 = vadd.xlane.f32.xlu0 %v903_v35  ;;  %v906_v36 = vsel %vm231_vm2, %v2872_v34, 0.0  ;;  %v1263_v45 = vpop.permute.xlu0 %1262 }
 0x38d   :  { %907 = vadd.xlane.f32.xlu1 %v906_v36 }
 0x38e   :  { %v2878_v37 = vpop.eup %2447 }
 0x38f   :  { %v2880_v38 = vpop.eup %2449  ;;  %v909_v39 = vsel %vm231_vm2, %v2878_v37, 0.0  ;;  %v2894_v46 = vpop.permute.xlu1 %1338 }
 0x390   :  { %910 = vadd.xlane.f32.xlu0 %v909_v39  ;;  %v912_v40 = vsel %vm231_vm2, %v2880_v38, 0.0 }
 0x391   :  { %913 = vadd.xlane.f32.xlu1 %v912_v40 }
 0x392   :  { %v2886_v41 = vpop.eup %2451 }
 0x393   :  { %v915_v42 = vsel %vm231_vm2, %v2886_v41, 0.0 }
 0x394   :  { %916 = vadd.xlane.f32.xlu0 %v915_v42 }
 0x3a2   :  { %1490 = vrot.lane.b32.xlu1 %v2781_v18, %s2635_s19 }
 0x3aa   :  { %1414 = vrot.lane.b32.xlu0 %v2783_v19, %s2635_s19 }
 0x3bc   :  { %v899_v47 = vpop.xlane.xlu0 %898 }
 0x3bd   :  { %2453 = vrcp.f32 %v899_v47 }
 0x3c0   :  { %v896_v48 = vpop.xlane.xlu1 %895 }
 0x3c1   :  { %2455 = vrcp.f32 %v896_v48 }
 0x3c7   :  { %v2454_v49 = vpop.eup %2453 }
 0x3c8   :  { %v927_v50 = vmul.f32 %v2454_v49, %v899_v47 }
 0x3ca   :  { %v935_v51 = vsub.f32 2.0, %v927_v50 }
 0x3cb   :  { %v2456_v52 = vpop.eup %2455 }
 0x3cc   :  { %v943_v53 = vmul.f32 %v2454_v49, %v935_v51  ;;  %v926_v54 = vmul.f32 %v2456_v52, %v896_v48 }
 0x3ce   :  { %v2897_v18 = vmul.f32 %v2856_v2, %v943_v53  ;;  %v934_v55 = vsub.f32 2.0, %v926_v54 }
 0x3d0   :  { %v942_v19 = vmul.f32 %v2456_v52, %v934_v55  ;;  %2288 = vmatmul.mubr.msk.f32.vlgmr.msra.gmra.mrb[8].mxu1 %vm231_vm2, %v2897_v18  ;;  %v2071_v40 = vsel %vm231_vm2, %v2897_v18, 0.0  ;;  %v80_v55 = vld [vmem:[#allocation7 + $0x20] sm:$0xff] }
 0x3d1   :  { %2296 = vmatpush3.msra.mxu1 %v1187_v44  ;;  %2297 = vmatprep.mubr.msk.f32.mxu1 %vm2632_vm1, %v2629_v10 }
 0x3d2   :  { %v950_v56 = vmul.f32 %v2860_v4, %v942_v19  ;;  %2305 = vmatprep.subr.mxu1 %v2629_v10  ;;  %v81_v19 = vld [vmem:[#allocation7 + $0x28] sm:$0xff] }
 0x3d4   :  { %2283 = vmatmul.mubr.msk.f32.vlgmr.msra.gmra.mrb[10].mxu0 %vm231_vm2, %v950_v56 }
 0x3d5   :  { %2291 = vmatpush3.msra.mxu0 %v1111_v43  ;;  %2292 = vmatprep.mubr.msk.f32.mxu0 %vm2632_vm1, %v2629_v10 }
 0x3d6   :  { %2300 = vmatprep.subr.mxu0 %v2629_v10 }
 0x415   :  { %v902_v57 = vpop.xlane.xlu1 %901 }
 0x416   :  { %2457 = vrcp.f32 %v902_v57 }
 0x419   :  { %v905_v58 = vpop.xlane.xlu0 %904 }
 0x41a   :  { %2459 = vrcp.f32 %v905_v58  ;;  %v908_v59 = vpop.xlane.xlu1 %907 }
 0x41b   :  { %2461 = vrcp.f32 %v908_v59 }
 0x41d   :  { %v911_v60 = vpop.xlane.xlu0 %910 }
 0x41e   :  { %2463 = vrcp.f32 %v911_v60  ;;  %v914_v61 = vpop.xlane.xlu1 %913 }
 0x41f   :  { %2465 = vrcp.f32 %v914_v61 }
 0x420   :  { %v2458_v62 = vpop.eup %2457 }
 0x421   :  { %v928_v63 = vmul.f32 %v2458_v62, %v902_v57  ;;  %v917_v0 = vpop.xlane.xlu0 %916  ;;  %v83_v57 = vld [vmem:[#allocation7 + $0x38] sm:$0xff] }
 0x422   :  { %2467 = vrcp.f32 %v917_v0 }
 0x423   :  { %v936_v1 = vsub.f32 2.0, %v928_v63 }
 0x424   :  { %v2460_v2 = vpop.eup %2459 }
 0x425   :  { %v2462_v3 = vpop.eup %2461  ;;  %v944_v4 = vmul.f32 %v2458_v62, %v936_v1  ;;  %v929_v6 = vmul.f32 %v2460_v2, %v905_v58  ;;  %v1415_v32 = vpop.permute.xlu0 %1414 }
 0x426   :  { %v930_v8 = vmul.f32 %v2462_v3, %v908_v59 }
 0x427   :  { %v952_v9 = vmul.f32 %v2865_v29, %v944_v4  ;;  %v937_v11 = vsub.f32 2.0, %v929_v6  ;;  %v2064_v29 = vsel %vm231_vm2, %v950_v56, 0.0  ;;  %v82_v56 = vld [vmem:[#allocation7 + $0x30] sm:$0xff] }
 0x428   :  { %v2464_v12 = vpop.eup %2463  ;;  %v938_v13 = vsub.f32 2.0, %v930_v8  ;;  %v2384_v58 = vpack.c.bf16 %v83_v57, %v82_v56  ;;  %v2148_v56 = vld [vmem:[#allocation8 + $0x5] ss:$0 sm:$0xff] }
 0x429   :  { %v2466_v14 = vpop.eup %2465  ;;  %v945_v15 = vmul.f32 %v2460_v2, %v937_v11  ;;  %v931_v16 = vmul.f32 %v2464_v12, %v911_v60  ;;  %2293 = vmatmul.mubr.msk.f32.vlgmr.msra.gmra.mrb[12].mxu0 %vm231_vm2, %v952_v9  ;;  %v2065_v24 = vsel %vm231_vm2, %v952_v9, 0.0 }
 0x42a   :  { %v946_v17 = vmul.f32 %v2462_v3, %v938_v13  ;;  %v932_v20 = vmul.f32 %v2466_v14, %v914_v61  ;;  %2301 = vmatpush3.msra.mxu0 %v1263_v45  ;;  %2302 = vmatprep.mubr.msk.f32.mxu0 %vm2632_vm1, %v2629_v10 }
 0x42b   :  { %v953_v21 = vmul.f32 %v2870_v33, %v945_v15  ;;  %v939_v22 = vsub.f32 2.0, %v931_v16  ;;  %2310 = vmatprep.subr.mxu0 %v2629_v10  ;;  %v2066_v33 = vadd.f32 %v2065_v24, %v2064_v29  ;;  %v84_v24 = vld [vmem:[#allocation7 + $0x40] sm:$0xff]  ;;  %v113_v29 = vld [vmem:[#allocation5] sm:$0xff] }
 0x42c   :  { %v2468_v23 = vpop.eup %2467  ;;  %v954_v25 = vmul.f32 %v2872_v34, %v946_v17  ;;  %v940_v26 = vsub.f32 2.0, %v932_v20 }
 0x42d   :  { %v947_v27 = vmul.f32 %v2464_v12, %v939_v22  ;;  %v933_v28 = vmul.f32 %v2468_v23, %v917_v0  ;;  %2298 = vmatmul.mubr.msk.f32.vlgmr.msra.gmra.mrb[10].mxu1 %vm231_vm2, %v953_v21  ;;  %v2072_v35 = vsel %vm231_vm2, %v953_v21, 0.0 }
 0x42e   :  { %v2067_v30 = vsel %vm231_vm2, %v954_v25, 0.0  ;;  %v948_v31 = vmul.f32 %v2466_v14, %v940_v26  ;;  %2303 = vmatmul.mubr.msk.f32.vlgmr.msra.gmra.mrb[14].mxu0 %vm231_vm2, %v954_v25  ;;  %2306 = vmatpush3.msra.mxu1 %v2894_v46  ;;  %v2073_v45 = vadd.f32 %v2072_v35, %v2071_v40  ;;  %v85_v25 = vld [vmem:[#allocation7 + $0x48] sm:$0xff]  ;;  %v86_v26 = vld [vmem:[#allocation7 + $0x50] sm:$0xff] }
 0x42f   :  { %v955_v34 = vmul.f32 %v2878_v37, %v947_v27  ;;  %v941_v36 = vsub.f32 2.0, %v933_v28  ;;  %2311 = vmatpush3.msra.mxu0 %v1415_v32  ;;  %2307 = vmatprep.mubr.msk.f32.mxu1 %vm2632_vm1, %v2629_v10  ;;  %v2068_v42 = vadd.f32 %v2067_v30, %v2066_v33  ;;  %v1491_v37 = vpop.permute.xlu1 %1490  ;;  %v2388_v27 = vpack.c.bf16 %v85_v25, %v84_v24  ;;  %v87_v28 = vld [vmem:[#allocation7 + $0x58] sm:$0xff]  ;;  %v2145_v32 = vld [vmem:[#allocation8 + $0x1] ss:$0 sm:$0xff]  ;;  %v90_v25 = vld [vmem:[#allocation7 + $0x70] sm:$0xff] }
 0x430   :  { %v956_v39 = vmul.f32 %v2880_v38, %v948_v31  ;;  %2312 = vmatprep.mubr.msk.f32.mxu0 %vm2632_vm1, %v2629_v10  ;;  %2315 = vmatprep.subr.mxu1 %v2629_v10  ;;  %v2392_v30 = vpack.c.bf16 %v87_v28, %v86_v26  ;;  %v114_v31 = vld [vmem:[#allocation5 + $0x8] sm:$0xff]  ;;  %v92_v28 = vld [vmem:[#allocation7 + $0x80] sm:$0xff] }
 0x431   :  { %v2074_v43 = vsel %vm231_vm2, %v955_v34, 0.0  ;;  %v949_v44 = vmul.f32 %v2468_v23, %v941_v36  ;;  %2308 = vmatmul.mubr.msk.f32.vlgmr.msra.gmra.mrb[12].mxu1 %vm231_vm2, %v955_v34  ;;  %v91_v26 = vld [vmem:[#allocation7 + $0x78] sm:$0xff] }
 0x432   :  { %v2069_v46 = vsel %vm231_vm2, %v956_v39, 0.0  ;;  %2313 = vmatmul.mubr.msk.f32.vlgmr.msra.gmra.mrb[16].mxu0 %vm231_vm2, %v956_v39  ;;  %2316 = vmatpush3.msra.mxu1 %v1491_v37  ;;  %v2075_v48 = vadd.f32 %v2074_v43, %v2073_v45 }
 0x433   :  { %v957_v38 = vmul.f32 %v2886_v41, %v949_v44  ;;  %2317 = vmatprep.mubr.msk.f32.mxu1 %vm2632_vm1, %v2629_v10  ;;  %v2070_v47 = vadd.f32 %v2069_v46, %v2068_v42  ;;  %v2380_v10 = vpack.c.bf16 %v81_v19, %v80_v55  ;;  %2389 = vmatprep.subr.bf16.mxu1 %v2388_v27 }
 0x435   :  { %v2076_v49 = vsel %vm231_vm2, %v957_v38, 0.0  ;;  %2318 = vmatmul.mubr.msk.f32.vlgmr.msra.gmra.mrb[14].mxu1 %vm231_vm2, %v957_v38  ;;  %v2079_v50 = vmul.f32 0.25, %v2070_v47  ;;  %2381 = vmatprep.subr.bf16.mxu0 %v2380_v10 }
 0x436   :  { %v2077_v51 = vadd.f32 %v2076_v49, %v2075_v48  ;;  %2383 = vmatpush3.bf16.msra.mxu0 %v2380_v10  ;;  %2339 = vmatprep.mubr.msk.f32.mxu1 %vm119_vm0, %v113_v29  ;;  %v2150_v10 = vld [vmem:[#allocation8 + $0x2] ss:$0 sm:$0xff]  ;;  %v93_v29 = vld [vmem:[#allocation7 + $0x88] sm:$0xff] }
 0x437   :  { %2081 = vst.msk [vmem:[#allocation11] sm:$0xff] %vm231_vm2, %v2079_v50  ;;  %2385 = vmatprep.subr.bf16.mxu0 %v2384_v58  ;;  %2391 = vmatpush3.bf16.msra.mxu1 %v2388_v27  ;;  %v2400_v27 = vpack.c.bf16 %v91_v26, %v90_v25 }
 0x438   :  { %v2080_v52 = vmul.f32 0.25, %v2077_v51  ;;  %2393 = vmatprep.subr.bf16.mxu1 %v2392_v30 }
 0x43a   :  { %2082 = vst.msk [vmem:[#allocation11 + $0x8] sm:$0xff] %vm231_vm2, %v2080_v52  ;;  %2387 = vmatpush3.bf16.msra.mxu0 %v2384_v58  ;;  %v2149_v58 = vld [vmem:[#allocation8 + $0x6] ss:$0 sm:$0xff] }
 0x43b   :  { %2395 = vmatpush3.bf16.msra.mxu1 %v2392_v30  ;;  %v94_v30 = vld [vmem:[#allocation7 + $0x90] sm:$0xff] }
 0x43e   :  { %2340 = vmatmul.mubr.msk.f32.vlgmr.msra.gmra.mrb[16].mxu1 %vm119_vm0, %v114_v31  ;;  %v2404_v31 = vpack.c.bf16 %v93_v29, %v92_v28 }
 0x440   :  { %2405 = vmatprep.subr.bf16.mxu1 %v2404_v31 }
 0x441   :  { %2407 = vmatpush3.bf16.msra.mxu1 %v2404_v31 }
 0x4a3   :  { %v1106_v53 = vpop.f32.mrb[8].mxu1 }
 0x4a4   :  { %v2289_v54 = vpop.f32.mrb[9].mxu1 }
 0x4a7   :  { %v1030_v18 = vpop.f32.mrb[10].mxu0 }
 0x4a8   :  { %v2284_v41 = vpop.f32.mrb[11].mxu0 }
 0x4fc   :  { %v1182_v59 = vpop.f32.mrb[12].mxu0 }
 0x4fd   :  { %1568 = vrot.lane.b32.xlu0 %v1182_v59, %s2626_s6  ;;  %v2294_v60 = vpop.f32.mrb[13].mxu0 }
 0x500   :  { %v1258_v61 = vpop.f32.mrb[10].mxu1 }
 0x501   :  { %v1334_v62 = vpop.f32.mrb[14].mxu0  ;;  %1570 = vrot.lane.b32.xlu1 %v1258_v61, %s2626_s6  ;;  %v2299_v63 = vpop.f32.mrb[11].mxu1 }
 0x502   :  { %1576 = vrot.lane.b32.xlu0 %v1334_v62, %s2636_s20  ;;  %v2304_v0 = vpop.f32.mrb[15].mxu0 }
 0x504   :  { %v1410_v1 = vpop.f32.mrb[12].mxu1 }
 0x505   :  { %v1486_v2 = vpop.f32.mrb[16].mxu0  ;;  %1578 = vrot.lane.b32.xlu1 %v1410_v1, %s2636_s20  ;;  %v2309_v3 = vpop.f32.mrb[13].mxu1 }
 0x506   :  { %1584 = vrot.lane.b32.xlu0 %v1486_v2, %s2637_s22  ;;  %v2314_v4 = vpop.f32.mrb[17].mxu0 }
 0x508   :  { %v1562_v6 = vpop.f32.mrb[14].mxu1 }
 0x509   :  { %1586 = vrot.lane.b32.xlu1 %v1562_v6, %s2637_s22  ;;  %v2319_v8 = vpop.f32.mrb[15].mxu1 }
 0x56f   :  { %v1569_v9 = vpop.permute.xlu0 %1568 }
 0x570   :  { %v1590_v13 = vsel %vm231_vm2, %v1030_v18, %v1569_v9 }
 0x573   :  { %v1571_v11 = vpop.permute.xlu1 %1570 }
 0x574   :  { %v1577_v12 = vpop.permute.xlu0 %1576  ;;  %v1591_v20 = vsel %vm231_vm2, %v1106_v53, %v1571_v11 }
 0x575   :  { %v1593_v15 = vsel %vm1592_vm3, %v1590_v13, %v1577_v12 }
 0x577   :  { %v1579_v14 = vpop.permute.xlu1 %1578 }
 0x578   :  { %v1585_v16 = vpop.permute.xlu0 %1584  ;;  %v1594_v21 = vsel %vm1592_vm3, %v1591_v20, %v1579_v14 }
 0x579   :  { %v1596_v17 = vsel %vm1595_vm4, %v1593_v15, %v1585_v16 }
 0x57a   :  { %2328 = vmatprep.mubr.msk.f32.mxu0 %vm119_vm0, %v1596_v17 }
 0x57b   :  { %v1587_v22 = vpop.permute.xlu1 %1586 }
 0x57c   :  { %v1597_v23 = vsel %vm1595_vm4, %v1594_v21, %v1587_v22  ;;  %v88_v22 = vld [vmem:[#allocation7 + $0x60] sm:$0xff] }
 0x57d   :  { %2329 = vmatmul.mubr.msk.f32.vlgmr.msra.gmra.mrb[18].mxu0 %vm119_vm0, %v1597_v23  ;;  %v89_v23 = vld [vmem:[#allocation7 + $0x68] sm:$0xff] }
 0x57e   :  { %v2396_v24 = vpack.c.bf16 %v89_v23, %v88_v22 }
 0x580   :  { %2397 = vmatprep.subr.bf16.mxu0 %v2396_v24 }
 0x581   :  { %2399 = vmatpush3.bf16.msra.mxu0 %v2396_v24 }
 0x582   :  { %2401 = vmatprep.subr.bf16.mxu0 %v2400_v27 }
 0x585   :  { %2403 = vmatpush3.bf16.msra.mxu0 %v2400_v27 }
 0x650   :  { %v2330_v33 = vpop.f32.mrb[18].mxu0 }
 0x651   :  { %v1680_v35 = vadd.f32 %v2330_v33, %v2145_v32  ;;  %v1674_v34 = vpop.f32.mrb[19].mxu0 }
 0x652   :  { %v1675_v36 = vadd.f32 %v2145_v32, %v1674_v34  ;;  %v95_v32 = vld [vmem:[#allocation7 + $0x98] sm:$0xff]  ;;  %v97_v34 = vld [vmem:[#allocation7 + $0xa8] sm:$0xff] }
 0x653   :  { %v1684_v39 = vadd.f32 %v1680_v35, %v2748_v7  ;;  %v2408_v33 = vpack.c.bf16 %v95_v32, %v94_v30  ;;  %v96_v35 = vld [vmem:[#allocation7 + $0xa0] sm:$0xff] }
 0x654   :  { %v1683_v40 = vadd.f32 %v1675_v36, %v2744_v5  ;;  %v2341_v5 = vpop.f32.mrb[16].mxu1  ;;  %v2412_v36 = vpack.c.bf16 %v97_v34, %v96_v35 }
 0x655   :  { %v1688_v42 = vsel %vm119_vm0, %v1684_v39, 0.0  ;;  %v1800_v51 = vpop.f32.mrb[17].mxu1  ;;  %v1806_v2 = vadd.f32 %v2341_v5, %v2150_v10  ;;  %2409 = vmatprep.subr.bf16.mxu1 %v2408_v33 }
 0x656   :  { %1689 = vadd.xlane.f32.xlu1 %v1688_v42  ;;  %v1685_v43 = vsel %vm119_vm0, %v1683_v40, 0.0  ;;  %v1801_v59 = vadd.f32 %v2150_v10, %v1800_v51  ;;  %2411 = vmatpush3.bf16.msra.mxu1 %v2408_v33 }
 0x657   :  { %1686 = vadd.xlane.f32.xlu0 %v1685_v43  ;;  %2413 = vmatprep.subr.bf16.mxu1 %v2412_v36 }
 0x65a   :  { %2415 = vmatpush3.bf16.msra.mxu1 %v2412_v36 }
 0x6e3   :  { %v1690_v44 = vpop.xlane.xlu1 %1689 }
 0x6e4   :  { %v1693_v37 = vmul.f32 0.03125, %v1690_v44  ;;  %v1687_v45 = vpop.xlane.xlu0 %1686 }
 0x6e5   :  { %v1692_v46 = vmul.f32 0.03125, %v1687_v45 }
 0x6e6   :  { %v1695_v38 = vsub.f32 %v1684_v39, %v1693_v37 }
 0x6e7   :  { %v1694_v47 = vsub.f32 %v1683_v40, %v1692_v46  ;;  %v2153_v46 = vld [vmem:[#allocation8 + $0x7] ss:$0 sm:$0xff] }
 0x6e8   :  { %v1697_v50 = vmul.f32 %v1695_v38, %v1695_v38 }
 0x6e9   :  { %v1696_v48 = vmul.f32 %v1694_v47, %v1694_v47 }
 0x6ea   :  { %v1701_v7 = vsel %vm119_vm0, %v1697_v50, 0.0 }
 0x6eb   :  { %v1698_v49 = vsel %vm119_vm0, %v1696_v48, 0.0 }
 0x6ec   :  { %1699 = vadd.xlane.f32.xlu0 %v1698_v49 }
 0x6f0   :  { %1702 = vadd.xlane.f32.xlu0 %v1701_v7 }
 0x779   :  { %v1700_v52 = vpop.xlane.xlu0 %1699 }
 0x77a   :  { %v1704_v53 = vmul.f32 0.03125, %v1700_v52  ;;  %v98_v52 = vld [vmem:[#allocation7 + $0xb0] sm:$0xff] }
 0x77c   :  { %v1706_v54 = vadd.f32 1e-05, %v1704_v53  ;;  %v99_v53 = vld [vmem:[#allocation7 + $0xb8] sm:$0xff] }
 0x77d   :  { %v1703_v18 = vpop.xlane.xlu0 %1702 }
 0x77e   :  { %2469 = vrsqrt.f32 %v1706_v54  ;;  %v1705_v41 = vmul.f32 0.03125, %v1703_v18  ;;  %v2416_v54 = vpack.c.bf16 %v99_v53, %v98_v52  ;;  %v2155_v18 = vld [vmem:[#allocation8 + $0x3] ss:$0 sm:$0xff] }
 0x780   :  { %v1707_v55 = vadd.f32 1e-05, %v1705_v41  ;;  %2417 = vmatprep.subr.bf16.mxu1 %v2416_v54 }
 0x781   :  { %2419 = vmatpush3.bf16.msra.mxu1 %v2416_v54 }
 0x782   :  { %2471 = vrsqrt.f32 %v1707_v55 }
 0x788   :  { %v2470_v19 = vpop.eup %2469 }
 0x789   :  { %v1710_v57 = vmul.f32 %v2470_v19, %v1694_v47  ;;  %v2154_v47 = vld [vmem:[#allocation8 + $0x8] ss:$0 sm:$0xff] }
 0x78b   :  { %v1716_v60 = vmul.f32 %v2148_v56, %v1710_v57 }
 0x78c   :  { %v2472_v61 = vpop.eup %2471 }
 0x78d   :  { %v1722_v62 = vadd.f32 %v2149_v58, %v1716_v60  ;;  %v1711_v63 = vmul.f32 %v2472_v61, %v1695_v38 }
 0x78f   :  { %v1809_v0 = vadd.f32 %v1801_v59, %v1722_v62  ;;  %v1717_v1 = vmul.f32 %v2148_v56, %v1711_v63 }
 0x791   :  { %v1811_v3 = vsel %vm119_vm0, %v1809_v0, 0.0  ;;  %v1723_v4 = vadd.f32 %v2149_v58, %v1717_v1  ;;  %v2158_v58 = vld [vmem:[#allocation8 + $0x4] ss:$0 sm:$0xff] }
 0x792   :  { %1812 = vadd.xlane.f32.xlu1 %v1811_v3 }
 0x793   :  { %v1810_v6 = vadd.f32 %v1806_v2, %v1723_v4 }
 0x795   :  { %v1814_v8 = vsel %vm119_vm0, %v1810_v6, 0.0 }
 0x796   :  { %1815 = vadd.xlane.f32.xlu0 %v1814_v8 }
 0x81f   :  { %v1813_v9 = vpop.xlane.xlu1 %1812 }
 0x820   :  { %v1817_v11 = vmul.f32 0.03125, %v1813_v9 }
 0x822   :  { %v1819_v12 = vsub.f32 %v1809_v0, %v1817_v11 }
 0x823   :  { %v1816_v13 = vpop.xlane.xlu0 %1815 }
 0x824   :  { %v1818_v14 = vmul.f32 0.03125, %v1816_v13  ;;  %v1821_v15 = vmul.f32 %v1819_v12, %v1819_v12 }
 0x826   :  { %v1820_v16 = vsub.f32 %v1810_v6, %v1818_v14  ;;  %v1823_v17 = vsel %vm119_vm0, %v1821_v15, 0.0 }
 0x827   :  { %1824 = vadd.xlane.f32.xlu1 %v1823_v17 }
 0x828   :  { %v1822_v20 = vmul.f32 %v1820_v16, %v1820_v16 }
 0x82a   :  { %v1826_v21 = vsel %vm119_vm0, %v1822_v20, 0.0 }
 0x82b   :  { %1827 = vadd.xlane.f32.xlu0 %v1826_v21 }
 0x8b4   :  { %v1825_v39 = vpop.xlane.xlu1 %1824 }
 0x8b5   :  { %v1829_v40 = vmul.f32 0.03125, %v1825_v39 }
 0x8b7   :  { %v1831_v42 = vadd.f32 1e-05, %v1829_v40 }
 0x8b8   :  { %v1828_v43 = vpop.xlane.xlu0 %1827 }
 0x8b9   :  { %2473 = vrsqrt.f32 %v1831_v42  ;;  %v1830_v44 = vmul.f32 0.03125, %v1828_v43 }
 0x8bb   :  { %v1832_v37 = vadd.f32 1e-05, %v1830_v44 }
 0x8bd   :  { %2475 = vrsqrt.f32 %v1832_v37 }
 0x8c3   :  { %v2474_v45 = vpop.eup %2473 }
 0x8c4   :  { %v1835_v38 = vmul.f32 %v2474_v45, %v1819_v12 }
 0x8c6   :  { %v1841_v48 = vmul.f32 %v2153_v46, %v1835_v38 }
 0x8c7   :  { %v2476_v49 = vpop.eup %2475 }
 0x8c8   :  { %v1836_v50 = vmul.f32 %v2476_v49, %v1820_v16  ;;  %v1847_v7 = vadd.f32 %v2154_v47, %v1841_v48 }
 0x8ca   :  { %v1842_v5 = vmul.f32 %v2153_v46, %v1836_v50  ;;  %2350 = vmatprep.mubr.msk.f32.mxu0 %vm119_vm0, %v1847_v7 }
 0x8cc   :  { %v1848_v51 = vadd.f32 %v2154_v47, %v1842_v5 }
 0x8ce   :  { %2351 = vmatmul.mubr.msk.f32.vlgmr.msra.gmra.mrb[20].mxu0 %vm119_vm0, %v1848_v51 }
 0x9a1   :  { %v2352_v41 = vpop.f32.mrb[20].mxu0 }
 0x9a2   :  { %v1931_v55 = vadd.f32 %v2352_v41, %v2155_v18  ;;  %v1925_v19 = vpop.f32.mrb[21].mxu0 }
 0x9a3   :  { %v1926_v10 = vadd.f32 %v2155_v18, %v1925_v19 }
 0x9a4   :  { %v1935_v57 = vmax.f32 %v1931_v55, 0.0 }
 0x9a5   :  { %v1934_v56 = vmax.f32 %v1926_v10, 0.0 }
 0x9a7   :  { %2369 = vmatprep.mubr.msk.f32.mxu1 %vm1940_vm5, %v1934_v56 }
 0x9a8   :  { %2370 = vmatmul.mubr.msk.f32.vlgmr.msra.gmra.mrb[18].mxu1 %vm1940_vm5, %v1935_v57 }
 0xa7b   :  { %v2371_v59 = vpop.f32.mrb[18].mxu1 }
 0xa7c   :  { %v2019_v60 = vadd.f32 %v2371_v59, %v2158_v58  ;;  %v2013_v61 = vpop.f32.mrb[19].mxu1 }
 0xa7d   :  { %v2014_v62 = vadd.f32 %v2158_v58, %v2013_v61 }
 0xa7e   :  { %v2023_v63 = vadd.f32 %v2019_v60, %v1848_v51 }
 0xa7f   :  { %v2022_v0 = vadd.f32 %v2014_v62, %v1847_v7 }
 0xa80   :  { %v2027_v1 = vsel %vm119_vm0, %v2023_v63, 0.0 }
 0xa81   :  { %2028 = vadd.xlane.f32.xlu0 %v2027_v1  ;;  %v2024_v2 = vsel %vm119_vm0, %v2022_v0, 0.0 }
 0xa82   :  { %2025 = vadd.xlane.f32.xlu1 %v2024_v2 }
 0xb0e   :  { %v2029_v3 = vpop.xlane.xlu0 %2028 }
 0xb0f   :  { %v2031_v4 = vmul.f32 0.03125, %v2029_v3  ;;  %v2026_v6 = vpop.xlane.xlu1 %2025 }
 0xb10   :  { %v2030_v8 = vmul.f32 0.03125, %v2026_v6 }
 0xb11   :  { %v2033_v9 = vsub.f32 %v2023_v63, %v2031_v4 }
 0xb12   :  { %v2032_v11 = vsub.f32 %v2022_v0, %v2030_v8 }
 0xb13   :  { %v2035_v12 = vmul.f32 %v2033_v9, %v2033_v9 }
 0xb14   :  { %v2034_v13 = vmul.f32 %v2032_v11, %v2032_v11 }
 0xb15   :  { %v2039_v14 = vsel %vm119_vm0, %v2035_v12, 0.0 }
 0xb16   :  { %2040 = vadd.xlane.f32.xlu0 %v2039_v14  ;;  %v2036_v15 = vsel %vm119_vm0, %v2034_v13, 0.0 }
 0xb17   :  { %2037 = vadd.xlane.f32.xlu1 %v2036_v15 }
 0xb18   :  { %2580 = shalt.err (!%p2577_p8)
}
 0xb19   :  { %s2581_s28 = scalar_lea.hbm %s3004_s5, 256 }
 0xb1a   :  { %p2582_p9 = scmp.ne.s32.totalorder %s3004_s5, %s2581_s28  ;;  %p2585_p10 = scmp.lt.u32.totalorder %s2581_s28, %s3004_s5 }
 0xb1c   :  { %p2587_p11 = pnand %p2585_p10, %p2582_p9 }
 0xb1e   :  { %2590 = shalt.err (!%p2587_p11)
}
 0xb1f   :  { %2106 = dma.vmem_to_hbm [thread:$0]  %s2101_s24, 256, %s3004_s5, [#allocation12], %s2625_s30, %s2625_s30, %s2626_s6   ;;  %v2161_v25 = vld [vmem:[#allocation8 + $0x9] ss:$0 sm:$0xff]  ;;  %v2162_v29 = vld [vmem:[#allocation8 + $0xa] ss:$0 sm:$0xff] }
 0xb20   :  { %s2639_s10 = smov [#allocation10]  }
 0xb21   :  { %s2088_s11 = sshll.u32 %s2639_s10, 4  ;;  %s2089_s11 = int_to_ptr.vmem [resolvable:$true] %s2088_s11 }
 0xb22   :  { %s2591_s5 = scalar_lea.vmem %s2089_s11, 256  ;;  %p2596_p13 = scmp.lt.s32.totalorder %s2089_s11, %s2089_s11 }
 0xb23   :  { %p2592_p12 = scmp.ne.s32.totalorder %s2089_s11, %s2591_s5  ;;  %p2597_p0 = scmp.lt.s32.totalorder %s2591_s5, %s2591_s5 }
 0xb25   :  { %p2598_p1 = por %p2597_p0, %p2596_p13 }
 0xb27   :  { %p2599_p2 = pnand %p2598_p1, %p2592_p12 }
 0xba3   :  { %v2041_v16 = vpop.xlane.xlu0 %2040 }
 0xba4   :  { %v2043_v17 = vmul.f32 0.03125, %v2041_v16  ;;  %v2038_v20 = vpop.xlane.xlu1 %2037 }
 0xba5   :  { %v2042_v21 = vmul.f32 0.03125, %v2038_v20 }
 0xba6   :  { %v2045_v22 = vadd.f32 1e-05, %v2043_v17 }
 0xba7   :  { %v2044_v23 = vadd.f32 1e-05, %v2042_v21 }
 0xba8   :  { %2477 = vrsqrt.f32 %v2045_v22 }
 0xba9   :  { %2479 = vrsqrt.f32 %v2044_v23 }
 0xbb2   :  { %v2478_v24 = vpop.eup %2477 }
 0xbb3   :  { %v2480_v26 = vpop.eup %2479  ;;  %v2049_v27 = vmul.f32 %v2478_v24, %v2033_v9 }
 0xbb4   :  { %v2048_v28 = vmul.f32 %v2480_v26, %v2032_v11 }
 0xbb5   :  { %v2055_v30 = vmul.f32 %v2161_v25, %v2049_v27 }
 0xbb6   :  { %v2054_v31 = vmul.f32 %v2161_v25, %v2048_v28 }
 0xbb7   :  { %v2061_v32 = vadd.f32 %v2162_v29, %v2055_v30 }
 0xbb8   :  { %v2060_v33 = vadd.f32 %v2162_v29, %v2054_v31 }
 0xbb9   :  { %2063 = vst.msk [vmem:[#allocation10 + $0x8] sm:$0xff] %vm119_vm0, %v2061_v32 }
 0xbba   :  { %2062 = vst.msk [vmem:[#allocation10] sm:$0xff] %vm119_vm0, %v2060_v33 }
 0xbbb   :  { %2602 = shalt.err (!%p2599_p2)
}
 0xbbc   :  { %s2603_s14 = scalar_lea.hbm %s3003_s4, 256 }
 0xbbd   :  { %p2604_p3 = scmp.ne.s32.totalorder %s3003_s4, %s2603_s14  ;;  %p2607_p4 = scmp.lt.u32.totalorder %s2603_s14, %s3003_s4 }
 0xbbf   :  { %p2609_p5 = pnand %p2607_p4, %p2604_p3 }
 0xbc1   :  { %2612 = shalt.err (!%p2609_p5)
}
 0xbc2   :  { %2094 = dma.vmem_to_hbm [thread:$0]  %s2089_s11, 256, %s3003_s4, [#allocation4], %s2625_s30, %s2625_s30, %s2626_s6  }
 0xbc3   :  { %2619 = dma.done.wait [#allocation4], 256  }
 0xbc4   :  { %2620 = vsyncadd [#allocation4], 4294967040 }
 0xbc5   :  { %2621 = dma.done.wait [#allocation12], 256  }
 0xbc6   :  { %2622 = vsyncadd [#allocation12], 4294967040 }
 0xbc7   :  { %2113 = vsyncpa [#allocation3], 1 }
 0xbc8   :  { %2114 = vsyncpa [#allocation6], 1 }
 0xbc9   :  { %2115 = vsyncpa [#allocation9], 1 }
 0xbca   :  { %2116 = vsyncpa [#allocation4], 1 }
 0xbcb   :  { %2117 = vsyncpa [#allocation12], 1 }

</bundles_post_ra>
